<compile_context>
chip_gen: v6e
topology: v6e:2x2x1
jax: 0.10.0
libtpu: 0.0.40
codegen_flags: <defaults>
</compile_context>

<pallas_src>
import functools

import jax
import jax.numpy as jnp
from jax.experimental import pallas as pl
from jax.experimental.pallas import tpu as pltpu


_LANE = 128
_TILE_CAP = 512   # max tile edge along a swapped axis that needs in-VMEM relayout


@functools.lru_cache(maxsize=None)
def _vmem_plan():
    """Generation-aware (per-block byte budget, vmem_limit_bytes).

    v7x needs the biggest blocks (3.2 TB/s HBM makes the ~0.35us/step overhead
    expensive) but has only 64 MiB VMEM per TensorCore; v5e/v6e have 128 MiB.
    Live footprint is ~4x the block (in+out, double-buffered), kept well inside
    the scoped limit on every generation.
    """
    cap = 64 * 1024 * 1024  # conservative default == v7x-class VMEM
    try:
        info = pltpu.get_tpu_info()
        c = getattr(info, "vmem_capacity_bytes", None)
        if c:
            cap = int(c)
    except Exception:
        pass
    if cap <= 96 * 1024 * 1024:                   # v7x-class (64 MiB VMEM)
        return 4 * 1024 * 1024, 32 * 1024 * 1024
    return 6 * 1024 * 1024, 64 * 1024 * 1024      # v5e / v6e (128 MiB VMEM)


def _copy_kernel(x_ref, o_ref):
    # One swapped axis has block extent 1 and every axis strictly between the
    # swapped pair has block extent 1, so the input and output blocks contain
    # the same bytes in the same order: the transpose is a pure reshape-copy
    # (the permutation lives entirely in the output BlockSpec index_map).
    o_ref[...] = x_ref[...].reshape(o_ref.shape)


def _swap_kernel(x_ref, o_ref, *, a, b):
    # Minor-axis transpose of one VMEM tile (XLU / sublane relayout).
    o_ref[...] = jnp.swapaxes(x_ref[...], a, b)


def _legal_block(dim, unit, want):
    """Largest legal block extent <= want: a multiple of `unit`, or the full dim."""
    want = min(want, dim)
    if want >= dim:
        return dim
    if unit <= 1:
        return max(1, want)
    w = (want // unit) * unit
    if w >= unit:
        return w
    return min(unit, dim)   # smallest legal non-full block


def _swap_tile(dim, unit, cap=_TILE_CAP):
    """Tile for a swapped axis that needs in-VMEM relayout.

    Full extent if it fits under the cap.  Otherwise prefer a divisor multiple
    of `unit` in (cap/2, cap] (no padded edge block); else the largest multiple
    of `unit` <= cap and let pl.cdiv + masked edge blocks handle the remainder
    (never fall back to the full extent -> no VMEM blow-up on odd dims).
    """
    if dim <= cap:
        return dim
    top = (cap // unit) * unit
    t = top
    while t * 2 > top:
        if dim % t == 0:
            return t
        t -= unit
    return top


def transpose_pallas(x, dim0, dim1):
    nd = x.ndim
    d0 = dim0 % nd
    d1 = dim1 % nd
    if d0 == d1:
        return x
    d0, d1 = sorted((d0, d1))

    shape = x.shape
    out_shape = list(shape)
    out_shape[d0], out_shape[d1] = out_shape[d1], out_shape[d0]
    out_shape = tuple(out_shape)

    itemsize = jnp.dtype(x.dtype).itemsize
    sublane = {4: 8, 2: 16, 1: 32}.get(itemsize, 8)
    tile_budget, vmem_limit = _vmem_plan()

    # Alignment unit per INPUT axis: a non-full block along axis `a` must be a
    # multiple of the strictest minor-position constraint it sees in either the
    # input block (position a) or the output block (its swapped position).
    def _pos_unit(p):
        if p == nd - 1:
            return _LANE
        if p == nd - 2:
            return sublane
        return 1

    def _swap_pos(a):
        return d1 if a == d0 else d0 if a == d1 else a

    unit = [max(_pos_unit(a), _pos_unit(_swap_pos(a))) for a in range(nd)]

    block = list(shape)          # start from "everything resident"
    use_copy = False

    if d1 >= nd - 2:
        # Swap touches the minor two axes -> in-kernel relayout of aligned tiles.
        block[d0] = _swap_tile(shape[d0], unit[d0])
        block[d1] = _swap_tile(shape[d1], unit[d1])
        if d1 == nd - 1 and d0 < nd - 2:
            # Lane axis swapped with a leading axis: keep the untouched sublane
            # axis to one packed sublane group so the relayout is a batch of
            # 2-D lane transposes, not a generic 3-axis shuffle.
            block[nd - 2] = shape[nd - 2] if shape[nd - 2] <= sublane else sublane
    else:
        # Both swapped axes are leading: pure-DMA permutation with FAT blocks.
        # Fatten whichever swapped axis yields the bigger block (ties -> d0,
        # which gives the longer contiguous output writes); the other swapped
        # axis and all axes strictly between the pair stay at block 1 so the
        # kernel reduces to a reshape-copy.
        use_copy = True
        rest = itemsize
        for a in range(nd):
            if a == d0 or a == d1 or (d0 < a < d1):
                continue
            rest *= shape[a]
        cap_fat = max(1, tile_budget // max(1, rest))
        eff0, eff1 = min(shape[d0], cap_fat), min(shape[d1], cap_fat)
        fat = d0 if eff0 >= eff1 else d1
        thin = d1 if fat == d0 else d0
        block[thin] = 1
        block[fat] = shape[fat]
        for a in range(d0 + 1, d1):
            block[a] = 1

    def _nbytes(blk):
        n = itemsize
        for v in blk:
            n *= v
        return n

    # ---- shrink to the per-block VMEM budget --------------------------------
    # Priority: (1) untouched leading axes, (2) swapped leading axes,
    # (3) minor axes (kept lane/sublane aligned via `unit`).  Axes are halved,
    # not collapsed straight to 1, so blocks land near the budget sweet spot.
    group1 = [a for a in range(nd - 2) if a not in (d0, d1)]
    group2 = [a for a in (d0, d1) if a < nd - 2]
    group3 = [a for a in range(max(0, nd - 2), nd)]
    exhausted = set()
    while _nbytes(block) > tile_budget:
        picked = None
        for grp in (group1, group2, group3):
            for a in sorted((a for a in grp if a not in exhausted),
                            key=lambda a: -block[a]):
                nb = _legal_block(shape[a], unit[a], block[a] // 2)
                if nb < block[a]:
                    picked = (a, nb)
                    break
                exhausted.add(a)
            if picked is not None:
                break
        if picked is None:
            break   # at the legal floor; accept (floors are tiny, always fits)
        block[picked[0]] = picked[1]

    # ---- v7x megacore: a single-block case >= 1 MiB is split once so both ---
    # TensorCores get a parallel grid step (no-op on v5e/v6e).
    grid = tuple(pl.cdiv(shape[a], block[a]) for a in range(nd))
    if all(g == 1 for g in grid) and _nbytes(block) >= (1 << 20):
        for a in sorted(range(nd), key=lambda a: -block[a]):
            nb = _legal_block(shape[a], unit[a], block[a] // 2)
            if nb < block[a]:
                block[a] = nb
                break
        grid = tuple(pl.cdiv(shape[a], block[a]) for a in range(nd))

    in_block = tuple(block)
    out_block = list(block)
    out_block[d0], out_block[d1] = block[d1], block[d0]
    out_block = tuple(out_block)

    def in_index_map(*g):
        return tuple(g)

    def out_index_map(*g):
        idx = list(g)
        idx[d0], idx[d1] = idx[d1], idx[d0]
        return tuple(idx)

    kernel = _copy_kernel if use_copy else functools.partial(_swap_kernel, a=d0, b=d1)

    return pl.pallas_call(
        kernel,
        out_shape=jax.ShapeDtypeStruct(out_shape, x.dtype),
        grid=grid,
        in_specs=[pl.BlockSpec(in_block, in_index_map)],
        out_specs=pl.BlockSpec(out_block, out_index_map),
        compiler_params=pltpu.CompilerParams(
            dimension_semantics=("parallel",) * nd,
            vmem_limit_bytes=vmem_limit,
        ),
    )(x)


class Transpose:
    """JAX/Pallas equivalent of the PyTorch Transpose(nn.Module)."""

    def __init__(self, *transpose):
        assert len(transpose) == 2, "Transpose expects exactly two dims"
        self.transpose = transpose

    def __call__(self, x):
        return transpose_pallas(x, *self.transpose)


if __name__ == "__main__":
    key = jax.random.PRNGKey(0)
    # Small NCHW-like input, consistent with a typical conv-feature-map use.
    x = jax.random.normal(key, (2, 4, 16, 16), dtype=jnp.float32)

    # 1) swap the two minor (spatial) dims -> in-kernel lane transpose.
    y = jax.block_until_ready(Transpose(2, 3)(x))
    assert y.shape == (2, 4, 16, 16)
    assert jnp.allclose(y, jnp.swapaxes(x, 2, 3))

    # 2) swap two leading dims -> fat reshape-copy blocks, swap in the index_map.
    z = jax.block_until_ready(Transpose(0, 1)(x))
    assert z.shape == (4, 2, 16, 16)
    assert jnp.allclose(z, jnp.swapaxes(x, 0, 1))

    # 3) channel <-> height (sublane axis involved, lane axis untouched).
    w = jax.block_until_ready(Transpose(1, 2)(x))
    assert w.shape == (2, 16, 4, 16)
    assert jnp.allclose(w, jnp.swapaxes(x, 1, 2))

    # 4) negative dims, torch convention: transpose(-1, -2) == transpose(2, 3).
    v = jax.block_until_ready(Transpose(-1, -2)(x))
    assert jnp.allclose(v, jnp.swapaxes(x, -1, -2))

    # 5) multi-step minor-2D transpose with 512-wide lane-dense tiles.
    x2 = jax.random.normal(jax.random.PRNGKey(0), (1, 1024, 768), dtype=jnp.float32)
    u = jax.block_until_ready(Transpose(1, 2)(x2))
    assert u.shape == (1, 768, 1024)
    assert jnp.allclose(u, jnp.swapaxes(x2, 1, 2))

    # 6) non-128-divisible swapped dim -> aligned interior tiles, masked edge block.
    x3 = jax.random.normal(jax.random.PRNGKey(0), (1, 520, 384), dtype=jnp.float32)
    t = jax.block_until_ready(Transpose(1, 2)(x3))
    assert t.shape == (1, 384, 520)
    assert jnp.allclose(t, jnp.swapaxes(x3, 1, 2))

    # 7) leading-dims swap with a multi-step grid (fat copy path).
    x4 = jax.random.normal(jax.random.PRNGKey(0), (4, 8, 32, 128), dtype=jnp.float32)
    s = jax.block_until_ready(Transpose(0, 1)(x4))
    assert s.shape == (8, 4, 32, 128)
    assert jnp.allclose(s, jnp.swapaxes(x4, 0, 1))

    print("KERNEL_OK")
</pallas_src>

<mosaic_0001>
module attributes {stable_mosaic.version = 11 : i64} {
  func.func @_swap_kernel(%arg0: i32, %arg1: i32, %arg2: i32, %arg3: i32, %arg4: memref<2x4x16x16xf32, #tpu.memory_space<vmem>>, %arg5: memref<2x4x16x16xf32, #tpu.memory_space<vmem>>) attributes {dimension_semantics = [#tpu.dimension_semantics<parallel>, #tpu.dimension_semantics<parallel>, #tpu.dimension_semantics<parallel>, #tpu.dimension_semantics<parallel>], iteration_bounds = array<i64: 1, 1, 1, 1>, scalar_prefetch = 0 : i64, scratch_operands = 0 : i64, tpu.core_type = #tpu.core_type<tc>, window_params = [{transform_indices = @transform_0, window_bounds = array<i64: 2, 4, 16, 16>}, {transform_indices = @transform_1, window_bounds = array<i64: 2, 4, 16, 16>}]} {
    %c0 = arith.constant 0 : index
    %c0_0 = arith.constant 0 : index
    %c0_1 = arith.constant 0 : index
    %c0_2 = arith.constant 0 : index
    %0 = vector.load %arg4[%c0, %c0_0, %c0_1, %c0_2] : memref<2x4x16x16xf32, #tpu.memory_space<vmem>>, vector<2x4x16x16xf32>
    %1 = tpu.transpose %0, [0, 1, 3, 2] : vector<2x4x16x16xf32> -> vector<2x4x16x16xf32>
    %c0_3 = arith.constant 0 : index
    %c0_4 = arith.constant 0 : index
    %c0_5 = arith.constant 0 : index
    %c0_6 = arith.constant 0 : index
    %2 = vector.load %arg5[%c0_3, %c0_4, %c0_5, %c0_6] : memref<2x4x16x16xf32, #tpu.memory_space<vmem>>, vector<2x4x16x16xf32>
    tpu.vector_store %arg5[%c0_3, %c0_4, %c0_5, %c0_6], %1 {strides = array<i32>} : memref<2x4x16x16xf32, #tpu.memory_space<vmem>>, vector<2x4x16x16xf32>,
    return
  }
  func.func @transform_0(%arg0: i32, %arg1: i32, %arg2: i32, %arg3: i32) -> (i32, i32, i32, i32) {
    %c0_i32 = arith.constant 0 : i32
    return %arg0, %arg1, %arg2, %arg3 : i32, i32, i32, i32
  }
  func.func @transform_1(%arg0: i32, %arg1: i32, %arg2: i32, %arg3: i32) -> (i32, i32, i32, i32) {
    %c0_i32 = arith.constant 0 : i32
    return %arg0, %arg1, %arg3, %arg2 : i32, i32, i32, i32
  }
}

</mosaic_0001>

<bundles_post_ra>
// kernel: tpu_custom_call.1
= control target key start
LH: loop header
LB: loop body
LE: loop exit
PB: predicated region body
PF: predicated region fallthrough
CT: control target
= control target key end

     0   :  { %6 = vsyncpa [#allocation3], 0  ;;  %s420_s0 = inlined_call_operand.hbm [shape: f32[2,4,16,16], index: 0, kind: input, shape index: {}]   ;;  %s421_s1 = inlined_call_operand.hbm [shape: f32[2,4,16,16], index: 1, kind: output, shape index: {}]  }
   0x1   :  { %7 = vsyncpa [#allocation4], 0  ;;  %s378_s6 = smov [#allocation2]  }
   0x2   :  { %s13_s7 = sshll.u32 %s378_s6, 4  ;;  %s14_s7 = int_to_ptr.vmem [resolvable:$true] %s13_s7 }
   0x3   :  { %s342_s8 = scalar_lea.vmem %s14_s7, 2048  ;;  %p347_p1 = scmp.lt.s32.totalorder %s14_s7, %s14_s7 }
   0x4   :  { %p343_p0 = scmp.ne.s32.totalorder %s14_s7, %s342_s8  ;;  %p348_p2 = scmp.lt.s32.totalorder %s342_s8, %s342_s8 }
   0x6   :  { %p349_p3 = por %p348_p2, %p347_p1 }
   0x8   :  { %p350_p4 = pnand %p349_p3, %p343_p0 }
   0xa   :  { %353 = shalt.err (!%p350_p4)
}
   0xb   :  { %s379_s9 = smov 128   ;;  %s380_s10 = smov 8  }
   0xc   :  { %19 = dma.hbm_to_vmem [thread:$0]  %s420_s0, 2048, %s14_s7, [#allocation3], %s379_s9, %s379_s9, %s380_s10  }
   0xd   :  { %374 = dma.done.wait [#allocation3], 2048  }
   0xe   :  { %375 = vsyncadd [#allocation3], 4294965248  ;;  %v25_v0 = vld [vmem:[#allocation2 + $0x10] sm:$0xff]  ;;  %v23_v1 = vld [vmem:[#allocation2] sm:$0xff]  ;;  %vm295_vm0 = vcmask 130048   ;;  %s381_s0 = smov [#allocation5]  }
   0xf   :  { %71 = vxpose.xlu1.b32.start [1/2] (short) (narrow) %v25_v0, 16  ;;  %39 = vxpose.xlu0.b32.start [1/2] (short) (narrow) %v23_v1, 16  ;;  %v26_v2 = vld [vmem:[#allocation2 + $0x18] sm:$0xff]  ;;  %v24_v3 = vld [vmem:[#allocation2 + $0x8] sm:$0xff]  ;;  %v29_v4 = vld [vmem:[#allocation2 + $0x30] sm:$0xff]  ;;  %s317_s13 = sshll.u32 %s381_s0, 4  ;;  %s318_s13 = int_to_ptr.vmem [resolvable:$true] %s317_s13 }
  0x10   :  { %v27_v5 = vld [vmem:[#allocation2 + $0x20] sm:$0xff]  ;;  %v30_v6 = vld [vmem:[#allocation2 + $0x38] sm:$0xff]  ;;  %v28_v7 = vld [vmem:[#allocation2 + $0x28] sm:$0xff]  ;;  %s354_s14 = scalar_lea.vmem %s318_s13, 2048  ;;  %p359_p6 = scmp.lt.s32.totalorder %s318_s13, %s318_s13 }
  0x11   :  { %v33_v8 = vld [vmem:[#allocation2 + $0x50] sm:$0xff]  ;;  %v31_v9 = vld [vmem:[#allocation2 + $0x40] sm:$0xff]  ;;  %v34_v10 = vld [vmem:[#allocation2 + $0x58] sm:$0xff]  ;;  %p355_p5 = scmp.ne.s32.totalorder %s318_s13, %s354_s14  ;;  %p360_p7 = scmp.lt.s32.totalorder %s354_s14, %s354_s14 }
  0x12   :  { %v32_v11 = vld [vmem:[#allocation2 + $0x48] sm:$0xff]  ;;  %v37_v12 = vld [vmem:[#allocation2 + $0x70] sm:$0xff]  ;;  %v35_v13 = vld [vmem:[#allocation2 + $0x60] sm:$0xff] }
  0x13   :  { %72 = vxpose.xlu1.b32.end [2/2] (short) (narrow) %v26_v2, 16  ;;  %40 = vxpose.xlu0.b32.end [2/2] (short) (narrow) %v24_v3, 16  ;;  %v38_v14 = vld [vmem:[#allocation2 + $0x78] sm:$0xff]  ;;  %v36_v15 = vld [vmem:[#allocation2 + $0x68] sm:$0xff]  ;;  %p361_p8 = por %p360_p7, %p359_p6 }
  0x15   :  { %p362_p9 = pnand %p361_p8, %p355_p5 }
  0x17   :  { %135 = vxpose.xlu1.b32.start [1/2] (short) (narrow) %v29_v4, 16  ;;  %103 = vxpose.xlu0.b32.start [1/2] (short) (narrow) %v27_v5, 16 }
  0x1b   :  { %136 = vxpose.xlu1.b32.end [2/2] (short) (narrow) %v30_v6, 16  ;;  %104 = vxpose.xlu0.b32.end [2/2] (short) (narrow) %v28_v7, 16 }
  0x1f   :  { %199 = vxpose.xlu1.b32.start [1/2] (short) (narrow) %v33_v8, 16  ;;  %167 = vxpose.xlu0.b32.start [1/2] (short) (narrow) %v31_v9, 16 }
  0x23   :  { %200 = vxpose.xlu1.b32.end [2/2] (short) (narrow) %v34_v10, 16  ;;  %168 = vxpose.xlu0.b32.end [2/2] (short) (narrow) %v32_v11, 16 }
  0x27   :  { %263 = vxpose.xlu1.b32.start [1/2] (short) (narrow) %v37_v12, 16  ;;  %231 = vxpose.xlu0.b32.start [1/2] (short) (narrow) %v35_v13, 16 }
  0x2b   :  { %264 = vxpose.xlu1.b32.end [2/2] (short) (narrow) %v38_v14, 16  ;;  %232 = vxpose.xlu0.b32.end [2/2] (short) (narrow) %v36_v15, 16 }
  0x8b   :  { %v87_v16 = vpop.trf.xlu1  ;;  %v55_v17 = vpop.trf.xlu0 }
  0x8c   :  { %298 = vst.msk [vmem:[#allocation5 + $0x10] sm:$0xff] %vm295_vm0, %v87_v16  ;;  %296 = vst.msk [vmem:[#allocation5] sm:$0xff] %vm295_vm0, %v55_v17 }
  0x8f   :  { %v88_v18 = vpop.trf.xlu1  ;;  %v56_v19 = vpop.trf.xlu0 }
  0x90   :  { %299 = vst.msk [vmem:[#allocation5 + $0x18] sm:$0xff] %vm295_vm0, %v88_v18  ;;  %297 = vst.msk [vmem:[#allocation5 + $0x8] sm:$0xff] %vm295_vm0, %v56_v19 }
  0x93   :  { %v151_v20 = vpop.trf.xlu1  ;;  %v119_v21 = vpop.trf.xlu0 }
  0x94   :  { %302 = vst.msk [vmem:[#allocation5 + $0x30] sm:$0xff] %vm295_vm0, %v151_v20  ;;  %300 = vst.msk [vmem:[#allocation5 + $0x20] sm:$0xff] %vm295_vm0, %v119_v21 }
  0x97   :  { %v152_v22 = vpop.trf.xlu1  ;;  %v120_v23 = vpop.trf.xlu0 }
  0x98   :  { %303 = vst.msk [vmem:[#allocation5 + $0x38] sm:$0xff] %vm295_vm0, %v152_v22  ;;  %301 = vst.msk [vmem:[#allocation5 + $0x28] sm:$0xff] %vm295_vm0, %v120_v23 }
  0x9b   :  { %v215_v24 = vpop.trf.xlu1  ;;  %v183_v25 = vpop.trf.xlu0 }
  0x9c   :  { %306 = vst.msk [vmem:[#allocation5 + $0x50] sm:$0xff] %vm295_vm0, %v215_v24  ;;  %304 = vst.msk [vmem:[#allocation5 + $0x40] sm:$0xff] %vm295_vm0, %v183_v25 }
  0x9f   :  { %v216_v26 = vpop.trf.xlu1  ;;  %v184_v27 = vpop.trf.xlu0 }
  0xa0   :  { %307 = vst.msk [vmem:[#allocation5 + $0x58] sm:$0xff] %vm295_vm0, %v216_v26  ;;  %305 = vst.msk [vmem:[#allocation5 + $0x48] sm:$0xff] %vm295_vm0, %v184_v27 }
  0xa3   :  { %v279_v28 = vpop.trf.xlu1  ;;  %v247_v29 = vpop.trf.xlu0 }
  0xa4   :  { %310 = vst.msk [vmem:[#allocation5 + $0x70] sm:$0xff] %vm295_vm0, %v279_v28  ;;  %308 = vst.msk [vmem:[#allocation5 + $0x60] sm:$0xff] %vm295_vm0, %v247_v29 }
  0xa7   :  { %v280_v30 = vpop.trf.xlu1  ;;  %v248_v31 = vpop.trf.xlu0 }
  0xa8   :  { %311 = vst.msk [vmem:[#allocation5 + $0x78] sm:$0xff] %vm295_vm0, %v280_v30  ;;  %309 = vst.msk [vmem:[#allocation5 + $0x68] sm:$0xff] %vm295_vm0, %v248_v31 }
  0xa9   :  { %365 = shalt.err (!%p362_p9)
}
  0xaa   :  { %323 = dma.vmem_to_hbm [thread:$0]  %s318_s13, 2048, %s421_s1, [#allocation4], %s379_s9, %s379_s9, %s380_s10  }
  0xab   :  { %376 = dma.done.wait [#allocation4], 2048  }
  0xac   :  { %377 = vsyncadd [#allocation4], 4294965248 }
  0xad   :  { %327 = vsyncpa [#allocation3], 1 }
  0xae   :  { %328 = vsyncpa [#allocation4], 1 }

</bundles_post_ra>
